<compile_context>
chip_gen: v7x
topology: tpu7x:2x2x1
jax: 0.10.0
libtpu: 0.0.40
codegen_flags: <defaults>
</compile_context>

<pallas_src>
import jax
import jax.numpy as jnp
from jax.experimental import pallas as pl
from jax.experimental.pallas import tpu as pltpu


def _nearest_matmul_kernel(x_ref, m_ref, o_ref):
    # x_ref: (block_rows, Q*W)  packed input rows
    # m_ref: (Q*W, P*W_out)     constant 0/1 replication matrix
    # o_ref: (block_rows, P*W_out) packed, lane-dense output rows
    o_ref[...] = jnp.dot(
        x_ref[...], m_ref[...], preferred_element_type=jnp.float32
    ).astype(o_ref.dtype)


def _choose_row_pack(scale, H, W_out):
    """Pick P = # output rows packed per lane-row so that the packed output
    last dim (P * W_out) is a multiple of 128, packs never cross image
    boundaries (P | H_out), and each pack needs only Q = P/scale input rows."""
    H_out = scale * H
    for P in range(scale, H_out + 1, scale):
        if H_out % P == 0 and (P * W_out) % 128 == 0:
            return P
    return scale  # fallback: correct, just not lane-dense


def interpolation_forward(x_nchw, *, scale_factor=2):
    """F.interpolate(x, scale_factor=scale_factor, mode='nearest') via Pallas."""
    s = int(scale_factor)
    N, C, H, W = x_nchw.shape
    H_out, W_out = s * H, s * W

    P = _choose_row_pack(s, H, W_out)   # output rows per packed lane-row
    Q = P // s                          # input rows feeding one pack
    NR = (N * C * H) // Q               # number of packed rows
    KIN = Q * W                         # packed input width
    KOUT = P * W_out                    # packed (lane-dense) output width

    # Free, contiguous reshape: no transpose, no padding, no HBM round trip.
    x_packed = x_nchw.reshape(NR, KIN)

    # Constant 0/1 replication matrix:
    #   M[q*W + w_in, a*W_out + j] = 1  iff  q == a // s  and  w_in == j // s
    p_idx = jnp.arange(KIN)
    k_idx = jnp.arange(KOUT)
    q_of_p, w_of_p = p_idx // W, p_idx % W
    a_of_k, j_of_k = k_idx // W_out, k_idx % W_out
    M = (
        (q_of_p[:, None] == (a_of_k[None, :] // s))
        & (w_of_p[:, None] == (j_of_k[None, :] // s))
    ).astype(x_nchw.dtype)

    # Row-block tiling: one block at demo size; multiple parallel blocks (and
    # bounded VMEM per block) at real feature-map sizes / on 2-TC v7x.
    block_rows = NR if NR <= 1024 else 1024
    grid = (pl.cdiv(NR, block_rows),)

    out_packed = pl.pallas_call(
        _nearest_matmul_kernel,
        out_shape=jax.ShapeDtypeStruct((NR, KOUT), x_nchw.dtype),
        grid_spec=pltpu.PrefetchScalarGridSpec(
            num_scalar_prefetch=0,
            grid=grid,
            in_specs=[
                pl.BlockSpec((block_rows, KIN), lambda i: (i, 0)),
                pl.BlockSpec((KIN, KOUT), lambda i: (0, 0)),
            ],
            out_specs=pl.BlockSpec((block_rows, KOUT), lambda i: (i, 0)),
        ),
        compiler_params=pltpu.CompilerParams(
            dimension_semantics=("parallel",)),
    )(x_packed, M)

    # Free reshape back to the PyTorch NCHW convention.
    return out_packed.reshape(N, C, H_out, W_out)


if __name__ == "__main__":
    key = jax.random.PRNGKey(0)
    N, C, H, W = 2, 4, 16, 16
    x = jax.random.normal(key, (N, C, H, W), dtype=jnp.float32)

    out = interpolation_forward(x, scale_factor=2)
    out = jax.block_until_ready(out)

    # Reference: nearest-neighbor 2x upsample (exactly what F.interpolate
    # with integer scale_factor and mode='nearest' computes).
    ref = jnp.repeat(jnp.repeat(x, 2, axis=2), 2, axis=3)
    ref = jax.block_until_ready(ref)

    assert out.shape == (N, C, 2 * H, 2 * W)
    assert jnp.allclose(out, ref, atol=1e-6, rtol=0.0)

    print("KERNEL_OK")
</pallas_src>

<mosaic_0001>
module attributes {stable_mosaic.version = 11 : i64} {
  func.func @_nearest_matmul_kernel(%arg0: i32, %arg1: memref<64x32xf32, #tpu.memory_space<vmem>>, %arg2: memref<32x128xf32, #tpu.memory_space<vmem>>, %arg3: memref<64x128xf32, #tpu.memory_space<vmem>>) attributes {dimension_semantics = [#tpu.dimension_semantics<parallel>], iteration_bounds = array<i64: 1>, scalar_prefetch = 0 : i64, scratch_operands = 0 : i64, tpu.core_type = #tpu.core_type<tc>, window_params = [{transform_indices = @transform_0, window_bounds = array<i64: 64, 32>}, {pipeline_mode = #tpu.pipeline_mode<synchronous>, transform_indices = @transform_1, window_bounds = array<i64: 32, 128>}, {transform_indices = @transform_2, window_bounds = array<i64: 64, 128>}]} {
    %c0 = arith.constant 0 : index
    %c0_0 = arith.constant 0 : index
    %0 = vector.load %arg1[%c0, %c0_0] : memref<64x32xf32, #tpu.memory_space<vmem>>, vector<64x32xf32>
    %c0_1 = arith.constant 0 : index
    %c0_2 = arith.constant 0 : index
    %1 = vector.load %arg2[%c0_1, %c0_2] : memref<32x128xf32, #tpu.memory_space<vmem>>, vector<32x128xf32>
    %cst = arith.constant dense<0.000000e+00> : vector<64x128xf32>
    %2 = tpu.matmul %0, %1, %cst {dimension_numbers = #tpu.dot_dimension_numbers<[1], [0], [0], [1], [0, 0, 1, 1], [], []>} : vector<64x32xf32>, vector<32x128xf32>, vector<64x128xf32> -> vector<64x128xf32>
    %c0_3 = arith.constant 0 : index
    %c0_4 = arith.constant 0 : index
    %3 = vector.load %arg3[%c0_3, %c0_4] : memref<64x128xf32, #tpu.memory_space<vmem>>, vector<64x128xf32>
    tpu.vector_store %arg3[%c0_3, %c0_4], %2 {strides = array<i32>} : memref<64x128xf32, #tpu.memory_space<vmem>>, vector<64x128xf32>,
    return
  }
  func.func @transform_0(%arg0: i32) -> (i32, i32) {
    %c0_i32 = arith.constant 0 : i32
    %c0_i32_0 = arith.constant 0 : i32
    return %arg0, %c0_i32 : i32, i32
  }
  func.func @transform_1(%arg0: i32) -> (i32, i32) {
    %c0_i32 = arith.constant 0 : i32
    %c0_i32_0 = arith.constant 0 : i32
    %c0_i32_1 = arith.constant 0 : i32
    return %c0_i32, %c0_i32_0 : i32, i32
  }
  func.func @transform_2(%arg0: i32) -> (i32, i32) {
    %c0_i32 = arith.constant 0 : i32
    %c0_i32_0 = arith.constant 0 : i32
    return %arg0, %c0_i32 : i32, i32
  }
}

</mosaic_0001>

<bundles_post_ra>
// kernel: tpu_custom_call.1
= control target key start
LH: loop header
LB: loop body
LE: loop exit
PB: predicated region body
PF: predicated region fallthrough
CT: control target
= control target key end

     0   :  { %vm24_vm0 = vcmask 261120   ;;  %s331_s0 = inlined_call_operand.vmem [shape: f32[64,32], index: 0, kind: input, shape index: {}]   ;;  %s332_s1 = inlined_call_operand.vmem [shape: f32[32,128], index: 1, kind: input, shape index: {}]   ;;  %s333_s2 = inlined_call_operand.hbm [shape: f32[64,128], index: 2, kind: output, shape index: {}]  }
   0x1   :  { %v20_v0 = vld [vmem:[%s332_s1] sm:$0xff]  ;;  %v21_v1 = vld [vmem:[%s332_s1 + $0x8] sm:$0xff]  ;;  %v22_v2 = vld [vmem:[%s332_s1 + $0x10] sm:$0xff] }
   0x2   :  { %v218_v3 = vpack.c.bf16 %v21_v1, %v20_v0  ;;  %v23_v4 = vld [vmem:[%s332_s1 + $0x18] sm:$0xff]  ;;  %v12_v5 = vld [vmem:[%s331_s0] sm:$0xff] }
   0x3   :  { %v16_v6 = vld [vmem:[%s331_s0 + $0x20] sm:$0xff]  ;;  %v222_v7 = vpack.c.bf16 %v23_v4, %v22_v2  ;;  %206 = vmatprep.mubr.msk.f32.mxu0 %vm24_vm0, %v12_v5 }
   0x4   :  { %212 = vmatprep.mubr.msk.f32.mxu1 %vm24_vm0, %v16_v6  ;;  %219 = vmatprep.subr.bf16.mxu0 %v218_v3 }
   0x5   :  { %226 = vmatprep.subr.bf16.mxu1 %v218_v3  ;;  %221 = vmatpush3.bf16.msra.mxu0 %v218_v3 }
   0x6   :  { %228 = vmatpush3.bf16.msra.mxu1 %v218_v3 }
   0x7   :  { %7 = vsyncpa [#allocation3], 0  ;;  %223 = vmatprep.subr.bf16.mxu0 %v222_v7  ;;  %227 = vmatprep.subr.bf16.mxu1 %v222_v7  ;;  %v13_v8 = vld [vmem:[%s331_s0 + $0x8] sm:$0xff]  ;;  %v14_v10 = vld [vmem:[%s331_s0 + $0x10] sm:$0xff]  ;;  %s257_s4 = smov [#allocation2]  }
   0x8   :  { %v17_v9 = vld [vmem:[%s331_s0 + $0x28] sm:$0xff]  ;;  %v18_v11 = vld [vmem:[%s331_s0 + $0x30] sm:$0xff]  ;;  %v15_v12 = vld [vmem:[%s331_s0 + $0x18] sm:$0xff]  ;;  %s167_s5 = sshll.u32 %s257_s4, 4  ;;  %s168_s5 = int_to_ptr.vmem [resolvable:$true] %s167_s5 }
   0x9   :  { %225 = vmatpush3.bf16.msra.mxu0 %v222_v7  ;;  %v19_v13 = vld [vmem:[%s331_s0 + $0x38] sm:$0xff]  ;;  %s233_s0 = scalar_lea.vmem %s168_s5, 1024  ;;  %p238_p1 = scmp.lt.s32.totalorder %s168_s5, %s168_s5 }
   0xa   :  { %229 = vmatpush3.bf16.msra.mxu1 %v222_v7  ;;  %p234_p0 = scmp.ne.s32.totalorder %s168_s5, %s233_s0  ;;  %p239_p2 = scmp.lt.s32.totalorder %s233_s0, %s233_s0 }
   0xc   :  { %207 = vmatmul.mubr.msk.f32.vlgmr.msra.gmra.mrb[0].mxu0 %vm24_vm0, %v13_v8  ;;  %p240_p3 = por %p239_p2, %p238_p1 }
   0xd   :  { %213 = vmatmul.mubr.msk.f32.vlgmr.msra.gmra.mrb[0].mxu1 %vm24_vm0, %v17_v9  ;;  %209 = vmatprep.mubr.msk.f32.mxu0 %vm24_vm0, %v14_v10 }
   0xe   :  { %215 = vmatprep.mubr.msk.f32.mxu1 %vm24_vm0, %v18_v11  ;;  %p241_p4 = pnand %p240_p3, %p234_p0 }
  0x10   :  { %210 = vmatmul.mubr.msk.f32.gmra.mrb[2].mxu0 %vm24_vm0, %v15_v12 }
  0x11   :  { %216 = vmatmul.mubr.msk.f32.gmra.mrb[2].mxu1 %vm24_vm0, %v19_v13 }
  0xdf   :  { %v208_v14 = vpop.f32.mrb[0].mxu0 }
  0xe0   :  { %v214_v15 = vpop.f32.mrb[0].mxu1  ;;  %155 = vst [vmem:[#allocation2 + $0x8] sm:$0xff] %v208_v14  ;;  %v115_v16 = vpop.f32.mrb[1].mxu0 }
  0xe1   :  { %159 = vst [vmem:[#allocation2 + $0x28] sm:$0xff] %v214_v15  ;;  %v135_v17 = vpop.f32.mrb[1].mxu1  ;;  %154 = vst [vmem:[#allocation2] sm:$0xff] %v115_v16 }
  0xe2   :  { %158 = vst [vmem:[#allocation2 + $0x20] sm:$0xff] %v135_v17 }
  0xe3   :  { %v211_v18 = vpop.f32.mrb[2].mxu0 }
  0xe4   :  { %v217_v19 = vpop.f32.mrb[2].mxu1  ;;  %157 = vst [vmem:[#allocation2 + $0x18] sm:$0xff] %v211_v18  ;;  %v125_v20 = vpop.f32.mrb[3].mxu0 }
  0xe5   :  { %161 = vst [vmem:[#allocation2 + $0x38] sm:$0xff] %v217_v19  ;;  %v145_v21 = vpop.f32.mrb[3].mxu1  ;;  %156 = vst [vmem:[#allocation2 + $0x10] sm:$0xff] %v125_v20 }
  0xe6   :  { %160 = vst [vmem:[#allocation2 + $0x30] sm:$0xff] %v145_v21 }
  0xe7   :  { %244 = shalt.err (!%p241_p4)
}
  0xe8   :  { %s245_s8 = scalar_lea.hbm %s333_s2, 1024 }
  0xe9   :  { %p246_p5 = scmp.ne.s32.totalorder %s333_s2, %s245_s8  ;;  %p249_p6 = scmp.lt.u32.totalorder %s245_s8, %s333_s2 }
  0xeb   :  { %p251_p7 = pnand %p249_p6, %p246_p5 }
  0xed   :  { %254 = shalt.err (!%p251_p7)
}
  0xee   :  { %s258_s13 = smov 128   ;;  %s259_s14 = smov 8  }
  0xef   :  { %173 = dma.vmem_to_hbm [thread:$0]  %s168_s5, 1024, %s333_s2, [#allocation3], %s258_s13, %s258_s13, %s259_s14  }
  0xf0   :  { %255 = dma.done.wait [#allocation3], 1024  }
  0xf1   :  { %256 = vsyncadd [#allocation3], 4294966272 }
  0xf2   :  { %177 = vsyncpa [#allocation3], 1 }

</bundles_post_ra>
